<compile_context>
chip_gen: v6e
topology: v6e:2x2x1
jax: 0.10.0
libtpu: 0.0.40
codegen_flags: <defaults>
</compile_context>

<pallas_src>
import functools

import jax
import jax.numpy as jnp
from jax.experimental import pallas as pl
from jax.experimental.pallas import tpu as pltpu


# ---------------------------------------------------------------------------
# Kernel: one grid step = one batch tile of one view, entirely in VMEM.
# ---------------------------------------------------------------------------
def _dccae_view_kernel(x_ref, w_e1_ref, w_zhd_ref, w_d2_ref,
                       b_e1_ref, b_zhd_ref, b_d2_ref,
                       z_ref, recon_ref, *, l_pad):
    """
    x_ref:     (TB, D_pad)            padded input tile
    w_e1_ref:  (D_pad, H_pad)         encoder layer-1 weight
    w_zhd_ref: (H_pad, L_pad+H_pad)   fused [w_e2 | w_e2 @ w_d1]
    w_d2_ref:  (H_pad, D_pad)         decoder layer-2 weight
    b_*_ref:   (1, .)                 matching biases
    z_ref:     (TB, L_pad)            padded latent output tile
    recon_ref: (TB, D_pad)            padded reconstruction output tile
    """
    # encoder layer 1: h = relu(x @ W_e1 + b_e1)
    h = jnp.dot(x_ref[...], w_e1_ref[...],
                preferred_element_type=jnp.float32) + b_e1_ref[...]
    h = jnp.maximum(h, 0.0)                                   # ReLU (VPU)

    # One 256-wide MXU push produces both the latent and the folded
    # enc2->dec1 pre-activation: zhd = h @ [W_e2 | W_e2@W_d1] + [b_e2 | b_ed].
    zhd = jnp.dot(h, w_zhd_ref[...],
                  preferred_element_type=jnp.float32) + b_zhd_ref[...]
    z_ref[...] = zhd[:, :l_pad].astype(z_ref.dtype)           # lane-aligned slice
    hd = jnp.maximum(zhd[:, l_pad:], 0.0)                     # ReLU (VPU)

    # decoder layer 2: recon = hd @ W_d2 + b_d2
    recon = jnp.dot(hd, w_d2_ref[...],
                    preferred_element_type=jnp.float32) + b_d2_ref[...]
    recon_ref[...] = recon.astype(recon_ref.dtype)


# ---------------------------------------------------------------------------
# Wrapper
# ---------------------------------------------------------------------------
def _round_up(n, m):
    return ((n + m - 1) // m) * m


def _pad2(a, rows, cols):
    r, c = a.shape
    return jnp.pad(a, ((0, rows - r), (0, cols - c)))


def _view_forward(x, p, *, batch_tile=256):
    """Run one view's autoencoder: returns (z, recon) at true (unpadded) shapes."""
    B, D = x.shape
    H = p["w_e1"].shape[1]
    L = p["w_e2"].shape[1]

    # Per-dimension padding (lane-dense, MXU-friendly, exactness preserving:
    # zero rows/cols + zero bias padding).
    D_pad = _round_up(max(D, 128), 128)
    H_pad = _round_up(max(H, 128), 128)
    L_pad = _round_up(max(L, 128), 128)

    # Batch tiling: ~256 sublanes per tile (safe on v5e/v6e/v7x); small batches
    # use a single tile rounded up to the sublane granule.
    tb = batch_tile if B >= batch_tile else _round_up(max(B, 8), 8)
    B_pad = _round_up(B, tb)
    n_tiles = B_pad // tb

    # Algebraic fold of the latent bottleneck (no nonlinearity between enc2
    # and dec1), then fuse [w_e2 | w_ed] along N for one 256-wide matmul.
    w_ed = jnp.dot(p["w_e2"], p["w_d1"], precision=jax.lax.Precision.HIGHEST)
    b_ed = jnp.dot(p["b_e2"], p["w_d1"], precision=jax.lax.Precision.HIGHEST) + p["b_d1"]

    w_e1 = _pad2(p["w_e1"], D_pad, H_pad)                                # (D_pad, H_pad)
    w_zhd = jnp.concatenate([_pad2(p["w_e2"], H_pad, L_pad),
                             _pad2(w_ed, H_pad, H_pad)], axis=1)         # (H_pad, L_pad+H_pad)
    w_d2 = _pad2(p["w_d2"], H_pad, D_pad)                                # (H_pad, D_pad)
    b_e1 = _pad2(p["b_e1"], 1, H_pad)                                    # (1, H_pad)
    b_zhd = jnp.concatenate([_pad2(p["b_e2"], 1, L_pad),
                             _pad2(b_ed, 1, H_pad)], axis=1)             # (1, L_pad+H_pad)
    b_d2 = _pad2(p["b_d2"], 1, D_pad)                                    # (1, D_pad)
    xp = _pad2(x, B_pad, D_pad)                                          # (B_pad, D_pad)

    kernel = functools.partial(_dccae_view_kernel, l_pad=L_pad)

    z_pad, recon_pad = pl.pallas_call(
        kernel,
        out_shape=(jax.ShapeDtypeStruct((B_pad, L_pad), jnp.float32),
                   jax.ShapeDtypeStruct((B_pad, D_pad), jnp.float32)),
        grid=(n_tiles,),
        in_specs=[
            pl.BlockSpec((tb, D_pad), lambda i: (i, 0)),                 # x tile streams
            # Weights/biases: constant block index -> stay VMEM-resident
            # across batch tiles (no re-DMA).
            pl.BlockSpec((D_pad, H_pad), lambda i: (0, 0)),
            pl.BlockSpec((H_pad, L_pad + H_pad), lambda i: (0, 0)),
            pl.BlockSpec((H_pad, D_pad), lambda i: (0, 0)),
            pl.BlockSpec((1, H_pad), lambda i: (0, 0)),
            pl.BlockSpec((1, L_pad + H_pad), lambda i: (0, 0)),
            pl.BlockSpec((1, D_pad), lambda i: (0, 0)),
        ],
        out_specs=(
            pl.BlockSpec((tb, L_pad), lambda i: (i, 0)),
            pl.BlockSpec((tb, D_pad), lambda i: (i, 0)),
        ),
        compiler_params=pltpu.CompilerParams(
            # Batch tiles are independent -> megacore-shard on v7x; harmless
            # sequential loop on v5e/v6e.
            dimension_semantics=("parallel",),
        ),
    )(xp, w_e1, w_zhd, w_d2, b_e1, b_zhd, b_d2)

    return z_pad[:B, :L], recon_pad[:B, :D]


def dccae_forward(x_1, x_2, params_1, params_2, *, batch_tile=256):
    """DCCAE.forward: returns ((z_1, z_2), (x_1_recon, x_2_recon))."""
    assert x_1.shape[0] == x_2.shape[0], "both views must share the batch dimension"
    z_1, recon_1 = _view_forward(x_1, params_1, batch_tile=batch_tile)
    z_2, recon_2 = _view_forward(x_2, params_2, batch_tile=batch_tile)
    return (z_1, z_2), (recon_1, recon_2)


# ---------------------------------------------------------------------------
# Parameter construction (PyTorch nn.Linear default init, weights pre-transposed)
# ---------------------------------------------------------------------------
def _uniform(key, shape, bound):
    return jax.random.uniform(key, shape, jnp.float32, -bound, bound)


def make_linear_params(key, fan_in, fan_out):
    """U(-1/sqrt(fan_in), 1/sqrt(fan_in)); weight returned as (fan_in, fan_out)."""
    kw, kb = jax.random.split(key)
    bound = 1.0 / (fan_in ** 0.5)
    w = _uniform(kw, (fan_in, fan_out), bound)
    b = _uniform(kb, (1, fan_out), bound)
    return w, b


def make_view_params(key, input_size, hidden, latent):
    ks = jax.random.split(key, 4)
    w_e1, b_e1 = make_linear_params(ks[0], input_size, hidden)
    w_e2, b_e2 = make_linear_params(ks[1], hidden, latent)
    w_d1, b_d1 = make_linear_params(ks[2], latent, hidden)
    w_d2, b_d2 = make_linear_params(ks[3], hidden, input_size)
    return dict(w_e1=w_e1, b_e1=b_e1, w_e2=w_e2, b_e2=b_e2,
                w_d1=w_d1, b_d1=b_d1, w_d2=w_d2, b_d2=b_d2)


# ---------------------------------------------------------------------------
# Pure-JAX reference (unfused, unfolded) for correctness checking
# ---------------------------------------------------------------------------
def dccae_forward_ref(x_1, x_2, params_1, params_2):
    def view(x, p):
        h = jnp.maximum(x @ p["w_e1"] + p["b_e1"], 0.0)
        z = h @ p["w_e2"] + p["b_e2"]
        hd = jnp.maximum(z @ p["w_d1"] + p["b_d1"], 0.0)
        recon = hd @ p["w_d2"] + p["b_d2"]
        return z, recon
    z1, r1 = view(x_1, params_1)
    z2, r2 = view(x_2, params_2)
    return (z1, z2), (r1, r2)


if __name__ == "__main__":
    # Small shapes consistent with the module defaults:
    #   batch=8, input_size_1=16, input_size_2=12, hidden=[128], latent_dims=2.
    key = jax.random.PRNGKey(0)
    k_x1, k_x2, k_p1, k_p2 = jax.random.split(key, 4)

    batch = 8
    input_size_1 = 16
    input_size_2 = 12
    hidden = 128
    latent_dims = 2

    x_1 = jax.random.normal(k_x1, (batch, input_size_1), jnp.float32)
    x_2 = jax.random.normal(k_x2, (batch, input_size_2), jnp.float32)

    params_1 = make_view_params(k_p1, input_size_1, hidden, latent_dims)
    params_2 = make_view_params(k_p2, input_size_2, hidden, latent_dims)

    fwd = jax.jit(functools.partial(dccae_forward))
    (z_1, z_2), (x_1_recon, x_2_recon) = fwd(x_1, x_2, params_1, params_2)
    jax.block_until_ready((z_1, z_2, x_1_recon, x_2_recon))

    # Correctness check against the unfused pure-JAX reference.
    (rz_1, rz_2), (rr_1, rr_2) = dccae_forward_ref(x_1, x_2, params_1, params_2)
    assert z_1.shape == (batch, latent_dims) and z_2.shape == (batch, latent_dims)
    assert x_1_recon.shape == (batch, input_size_1)
    assert x_2_recon.shape == (batch, input_size_2)
    for a, b in ((z_1, rz_1), (z_2, rz_2), (x_1_recon, rr_1), (x_2_recon, rr_2)):
        assert jnp.allclose(a, b, atol=1e-4, rtol=1e-4), "mismatch vs reference"

    print("KERNEL_OK")
</pallas_src>

<mosaic_0001>
module attributes {stable_mosaic.version = 11 : i64} {
  func.func @_dccae_view_kernel(%arg0: i32, %arg1: memref<8x128xf32, #tpu.memory_space<vmem>>, %arg2: memref<128x128xf32, #tpu.memory_space<vmem>>, %arg3: memref<128x256xf32, #tpu.memory_space<vmem>>, %arg4: memref<128x128xf32, #tpu.memory_space<vmem>>, %arg5: memref<1x128xf32, #tpu.memory_space<vmem>>, %arg6: memref<1x256xf32, #tpu.memory_space<vmem>>, %arg7: memref<1x128xf32, #tpu.memory_space<vmem>>, %arg8: memref<8x128xf32, #tpu.memory_space<vmem>>, %arg9: memref<8x128xf32, #tpu.memory_space<vmem>>) attributes {dimension_semantics = [#tpu.dimension_semantics<parallel>], iteration_bounds = array<i64: 1>, scalar_prefetch = 0 : i64, scratch_operands = 0 : i64, tpu.core_type = #tpu.core_type<tc>, window_params = [{transform_indices = @transform_0, window_bounds = array<i64: 8, 128>}, {pipeline_mode = #tpu.pipeline_mode<synchronous>, transform_indices = @transform_1, window_bounds = array<i64: 128, 128>}, {pipeline_mode = #tpu.pipeline_mode<synchronous>, transform_indices = @transform_2, window_bounds = array<i64: 128, 256>}, {pipeline_mode = #tpu.pipeline_mode<synchronous>, transform_indices = @transform_3, window_bounds = array<i64: 128, 128>}, {pipeline_mode = #tpu.pipeline_mode<synchronous>, transform_indices = @transform_4, window_bounds = array<i64: 1, 128>}, {pipeline_mode = #tpu.pipeline_mode<synchronous>, transform_indices = @transform_5, window_bounds = array<i64: 1, 256>}, {pipeline_mode = #tpu.pipeline_mode<synchronous>, transform_indices = @transform_6, window_bounds = array<i64: 1, 128>}, {transform_indices = @transform_7, window_bounds = array<i64: 8, 128>}, {transform_indices = @transform_8, window_bounds = array<i64: 8, 128>}]} {
    %c0 = arith.constant 0 : index
    %c0_0 = arith.constant 0 : index
    %0 = vector.load %arg1[%c0, %c0_0] : memref<8x128xf32, #tpu.memory_space<vmem>>, vector<8x128xf32>
    %c0_1 = arith.constant 0 : index
    %c0_2 = arith.constant 0 : index
    %1 = vector.load %arg2[%c0_1, %c0_2] : memref<128x128xf32, #tpu.memory_space<vmem>>, vector<128x128xf32>
    %cst = arith.constant dense<0.000000e+00> : vector<8x128xf32>
    %2 = tpu.matmul %0, %1, %cst {dimension_numbers = #tpu.dot_dimension_numbers<[1], [0], [0], [1], [0, 0, 1, 1], [], []>} : vector<8x128xf32>, vector<128x128xf32>, vector<8x128xf32> -> vector<8x128xf32>
    %c0_3 = arith.constant 0 : index
    %c0_4 = arith.constant 0 : index
    %3 = vector.load %arg5[%c0_3, %c0_4] : memref<1x128xf32, #tpu.memory_space<vmem>>, vector<1x128xf32>
    %4 = vector.broadcast %3 : vector<1x128xf32> to vector<8x128xf32>
    %5 = arith.addf %2, %4 : vector<8x128xf32>
    %cst_5 = arith.constant 0.000000e+00 : f32
    %6 = vector.broadcast %cst_5 : f32 to vector<8x128xf32>
    %7 = arith.maximumf %5, %6 : vector<8x128xf32>
    %c0_6 = arith.constant 0 : index
    %c0_7 = arith.constant 0 : index
    %8 = vector.load %arg3[%c0_6, %c0_7] : memref<128x256xf32, #tpu.memory_space<vmem>>, vector<128x256xf32>
    %cst_8 = arith.constant dense<0.000000e+00> : vector<8x256xf32>
    %9 = tpu.matmul %7, %8, %cst_8 {dimension_numbers = #tpu.dot_dimension_numbers<[1], [0], [0], [1], [0, 0, 1, 1], [], []>} : vector<8x128xf32>, vector<128x256xf32>, vector<8x256xf32> -> vector<8x256xf32>
    %c0_9 = arith.constant 0 : index
    %c0_10 = arith.constant 0 : index
    %10 = vector.load %arg6[%c0_9, %c0_10] : memref<1x256xf32, #tpu.memory_space<vmem>>, vector<1x256xf32>
    %11 = vector.broadcast %10 : vector<1x256xf32> to vector<8x256xf32>
    %12 = arith.addf %9, %11 : vector<8x256xf32>
    %13 = vector.extract_strided_slice %12 {offsets = [0, 0], sizes = [8, 128], strides = [1, 1]} : vector<8x256xf32> to vector<8x128xf32>
    %c0_11 = arith.constant 0 : index
    %c0_12 = arith.constant 0 : index
    %14 = vector.load %arg8[%c0_11, %c0_12] : memref<8x128xf32, #tpu.memory_space<vmem>>, vector<8x128xf32>
    tpu.vector_store %arg8[%c0_11, %c0_12], %13 {strides = array<i32>} : memref<8x128xf32, #tpu.memory_space<vmem>>, vector<8x128xf32>,
    %15 = vector.extract_strided_slice %12 {offsets = [0, 128], sizes = [8, 128], strides = [1, 1]} : vector<8x256xf32> to vector<8x128xf32>
    %cst_13 = arith.constant 0.000000e+00 : f32
    %16 = vector.broadcast %cst_13 : f32 to vector<8x128xf32>
    %17 = arith.maximumf %15, %16 : vector<8x128xf32>
    %c0_14 = arith.constant 0 : index
    %c0_15 = arith.constant 0 : index
    %18 = vector.load %arg4[%c0_14, %c0_15] : memref<128x128xf32, #tpu.memory_space<vmem>>, vector<128x128xf32>
    %cst_16 = arith.constant dense<0.000000e+00> : vector<8x128xf32>
    %19 = tpu.matmul %17, %18, %cst_16 {dimension_numbers = #tpu.dot_dimension_numbers<[1], [0], [0], [1], [0, 0, 1, 1], [], []>} : vector<8x128xf32>, vector<128x128xf32>, vector<8x128xf32> -> vector<8x128xf32>
    %c0_17 = arith.constant 0 : index
    %c0_18 = arith.constant 0 : index
    %20 = vector.load %arg7[%c0_17, %c0_18] : memref<1x128xf32, #tpu.memory_space<vmem>>, vector<1x128xf32>
    %21 = vector.broadcast %20 : vector<1x128xf32> to vector<8x128xf32>
    %22 = arith.addf %19, %21 : vector<8x128xf32>
    %c0_19 = arith.constant 0 : index
    %c0_20 = arith.constant 0 : index
    %23 = vector.load %arg9[%c0_19, %c0_20] : memref<8x128xf32, #tpu.memory_space<vmem>>, vector<8x128xf32>
    tpu.vector_store %arg9[%c0_19, %c0_20], %22 {strides = array<i32>} : memref<8x128xf32, #tpu.memory_space<vmem>>, vector<8x128xf32>,
    return
  }
  func.func @transform_0(%arg0: i32) -> (i32, i32) {
    %c0_i32 = arith.constant 0 : i32
    %c0_i32_0 = arith.constant 0 : i32
    return %arg0, %c0_i32 : i32, i32
  }
  func.func @transform_1(%arg0: i32) -> (i32, i32) {
    %c0_i32 = arith.constant 0 : i32
    %c0_i32_0 = arith.constant 0 : i32
    %c0_i32_1 = arith.constant 0 : i32
    return %c0_i32, %c0_i32_0 : i32, i32
  }
  func.func @transform_2(%arg0: i32) -> (i32, i32) {
    %c0_i32 = arith.constant 0 : i32
    %c0_i32_0 = arith.constant 0 : i32
    %c0_i32_1 = arith.constant 0 : i32
    return %c0_i32, %c0_i32_0 : i32, i32
  }
  func.func @transform_3(%arg0: i32) -> (i32, i32) {
    %c0_i32 = arith.constant 0 : i32
    %c0_i32_0 = arith.constant 0 : i32
    %c0_i32_1 = arith.constant 0 : i32
    return %c0_i32, %c0_i32_0 : i32, i32
  }
  func.func @transform_4(%arg0: i32) -> (i32, i32) {
    %c0_i32 = arith.constant 0 : i32
    %c0_i32_0 = arith.constant 0 : i32
    %c0_i32_1 = arith.constant 0 : i32
    return %c0_i32, %c0_i32_0 : i32, i32
  }
  func.func @transform_5(%arg0: i32) -> (i32, i32) {
    %c0_i32 = arith.constant 0 : i32
    %c0_i32_0 = arith.constant 0 : i32
    %c0_i32_1 = arith.constant 0 : i32
    return %c0_i32, %c0_i32_0 : i32, i32
  }
  func.func @transform_6(%arg0: i32) -> (i32, i32) {
    %c0_i32 = arith.constant 0 : i32
    %c0_i32_0 = arith.constant 0 : i32
    %c0_i32_1 = arith.constant 0 : i32
    return %c0_i32, %c0_i32_0 : i32, i32
  }
  func.func @transform_7(%arg0: i32) -> (i32, i32) {
    %c0_i32 = arith.constant 0 : i32
    %c0_i32_0 = arith.constant 0 : i32
    return %arg0, %c0_i32 : i32, i32
  }
  func.func @transform_8(%arg0: i32) -> (i32, i32) {
    %c0_i32 = arith.constant 0 : i32
    %c0_i32_0 = arith.constant 0 : i32
    return %arg0, %c0_i32 : i32, i32
  }
}

</mosaic_0001>

<bundles_post_ra>
// kernel: dccae_forward.2
= control target key start
LH: loop header
LB: loop body
LE: loop exit
PB: predicated region body
PF: predicated region fallthrough
CT: control target
= control target key end

     0   :  { %v484_v1 = vmov 0.0   ;;  %vm485_vm0 = vmmov 0   ;;  %s779_s0 = inlined_call_operand.vmem [shape: f32[8,128], index: 0, kind: input, shape index: {}]   ;;  %s780_s1 = inlined_call_operand.vmem [shape: f32[128,128], index: 1, kind: input, shape index: {}]   ;;  %s781_s2 = inlined_call_operand.vmem [shape: f32[128,256], index: 2, kind: input, shape index: {}]   ;;  %s782_s3 = inlined_call_operand.vmem [shape: f32[128,128], index: 3, kind: input, shape index: {}]   ;;  %s783_s4 = inlined_call_operand.vmem [shape: f32[1,128], index: 4, kind: input, shape index: {}]   ;;  %s784_s5 = inlined_call_operand.vmem [shape: f32[1,256], index: 5, kind: input, shape index: {}]   ;;  %s785_s6 = inlined_call_operand.vmem [shape: f32[1,128], index: 6, kind: input, shape index: {}]   ;;  %s786_s7 = inlined_call_operand.vmem [shape: f32[8,128], index: 7, kind: output, shape index: {0}]   ;;  %s787_s8 = inlined_call_operand.hbm [shape: f32[8,128], index: 8, kind: output, shape index: {1}]  }
   0x1   :  { %v45_v0 = vld [vmem:[%s780_s1 + $0x78] sm:$0xff]  ;;  %389 = vmatprep.subr.mxu0 %v484_v1  ;;  %v44_v2 = vld [vmem:[%s780_s1 + $0x70] sm:$0xff]  ;;  %421 = vmatprep.mubr.msk.f32.mxu0 %vm485_vm0, %v484_v1  ;;  %v43_v3 = vld [vmem:[%s780_s1 + $0x68] sm:$0xff] }
   0x2   :  { %390 = vmatpush3.msra.mxu0 %v45_v0  ;;  %232 = vmatprep.mubr.f32.mxu1 %v484_v1  ;;  %v42_v4 = vld [vmem:[%s780_s1 + $0x60] sm:$0xff]  ;;  %v155_v5 = vld [vmem:[%s781_s2 + $0xf8] sm:$0xff]  ;;  %v154_v6 = vld [vmem:[%s781_s2 + $0xf0] sm:$0xff] }
   0x3   :  { %391 = vmatprep.subr.mxu0 %v484_v1  ;;  %168 = vmatprep.subr.mxu1 %v155_v5  ;;  %v153_v7 = vld [vmem:[%s781_s2 + $0xe8] sm:$0xff]  ;;  %v152_v8 = vld [vmem:[%s781_s2 + $0xe0] sm:$0xff]  ;;  %v41_v9 = vld [vmem:[%s780_s1 + $0x58] sm:$0xff] }
   0x4   :  { %392 = vmatpush3.msra.mxu0 %v44_v2  ;;  %169 = vmatpush1.msra.mxu1 %v154_v6  ;;  %v151_v10 = vld [vmem:[%s781_s2 + $0xd8] sm:$0xff]  ;;  %v150_v11 = vld [vmem:[%s781_s2 + $0xd0] sm:$0xff]  ;;  %v149_v13 = vld [vmem:[%s781_s2 + $0xc8] sm:$0xff] }
   0x5   :  { %393 = vmatprep.subr.mxu0 %v484_v1  ;;  %170 = vmatprep.subr.mxu1 %v153_v7  ;;  %v40_v12 = vld [vmem:[%s780_s1 + $0x50] sm:$0xff]  ;;  %v148_v14 = vld [vmem:[%s781_s2 + $0xc0] sm:$0xff]  ;;  %v39_v15 = vld [vmem:[%s780_s1 + $0x48] sm:$0xff] }
   0x6   :  { %394 = vmatpush3.msra.mxu0 %v43_v3  ;;  %171 = vmatpush1.msra.mxu1 %v152_v8  ;;  %v147_v16 = vld [vmem:[%s781_s2 + $0xb8] sm:$0xff]  ;;  %v146_v17 = vld [vmem:[%s781_s2 + $0xb0] sm:$0xff]  ;;  %v38_v18 = vld [vmem:[%s780_s1 + $0x40] sm:$0xff] }
   0x7   :  { %395 = vmatprep.subr.mxu0 %v484_v1  ;;  %172 = vmatprep.subr.mxu1 %v151_v10  ;;  %v145_v19 = vld [vmem:[%s781_s2 + $0xa8] sm:$0xff]  ;;  %v144_v20 = vld [vmem:[%s781_s2 + $0xa0] sm:$0xff]  ;;  %v37_v21 = vld [vmem:[%s780_s1 + $0x38] sm:$0xff] }
   0x8   :  { %396 = vmatpush3.msra.mxu0 %v42_v4  ;;  %173 = vmatpush1.msra.mxu1 %v150_v11  ;;  %v143_v22 = vld [vmem:[%s781_s2 + $0x98] sm:$0xff] }
   0x9   :  { %397 = vmatprep.subr.mxu0 %v484_v1  ;;  %174 = vmatprep.subr.mxu1 %v149_v13 }
   0xa   :  { %398 = vmatpush3.msra.mxu0 %v41_v9  ;;  %175 = vmatpush1.msra.mxu1 %v148_v14 }
   0xb   :  { %399 = vmatprep.subr.mxu0 %v484_v1  ;;  %176 = vmatprep.subr.mxu1 %v147_v16 }
   0xc   :  { %400 = vmatpush3.msra.mxu0 %v40_v12  ;;  %177 = vmatpush1.msra.mxu1 %v146_v17 }
   0xd   :  { %401 = vmatprep.subr.mxu0 %v484_v1 }
   0xe   :  { %402 = vmatpush3.msra.mxu0 %v39_v15 }
   0xf   :  { %403 = vmatprep.subr.mxu0 %v484_v1 }
  0x10   :  { %14 = vsyncpa [#allocation3], 0  ;;  %404 = vmatpush3.msra.mxu0 %v38_v18  ;;  %178 = vmatprep.subr.mxu1 %v145_v19  ;;  %v142_v23 = vld [vmem:[%s781_s2 + $0x90] sm:$0xff]  ;;  %v141_v25 = vld [vmem:[%s781_s2 + $0x88] sm:$0xff]  ;;  %v158_v8 = vlaneseq  ;;  %s486_s25 = smov [#allocation2]  }
  0x11   :  { %405 = vmatprep.subr.mxu0 %v484_v1  ;;  %v36_v24 = vld [vmem:[%s780_s1 + $0x30] sm:$0xff]  ;;  %179 = vmatpush1.msra.mxu1 %v144_v20  ;;  %v140_v26 = vld [vmem:[%s781_s2 + $0x80] sm:$0xff]  ;;  %v35_v27 = vld [vmem:[%s780_s1 + $0x28] sm:$0xff]  ;;  %s343_s26 = sshll.u32 %s486_s25, 4  ;;  %s344_s26 = int_to_ptr.vmem [resolvable:$true] %s343_s26 }
  0x12   :  { %406 = vmatpush3.msra.mxu0 %v37_v21  ;;  %180 = vmatprep.subr.mxu1 %v143_v22  ;;  %v139_v28 = vld [vmem:[%s781_s2 + $0x78] sm:$0xff]  ;;  %v138_v29 = vld [vmem:[%s781_s2 + $0x70] sm:$0xff]  ;;  %v34_v30 = vld [vmem:[%s780_s1 + $0x20] sm:$0xff]  ;;  %v159_v9 = vshrl.u32 %v158_v8, 7  ;;  %p467_p1 = scmp.lt.s32.totalorder %s344_s26, %s344_s26 }
  0x13   :  { %407 = vmatprep.subr.mxu0 %v484_v1  ;;  %181 = vmatpush1.msra.mxu1 %v142_v23  ;;  %v137_v31 = vld [vmem:[%s781_s2 + $0x68] sm:$0xff]  ;;  %v136_v32 = vld [vmem:[%s781_s2 + $0x60] sm:$0xff]  ;;  %v33_v33 = vld [vmem:[%s780_s1 + $0x18] sm:$0xff] }
  0x14   :  { %408 = vmatpush3.msra.mxu0 %v36_v24  ;;  %182 = vmatprep.subr.mxu1 %v141_v25  ;;  %v135_v34 = vld [vmem:[%s781_s2 + $0x58] sm:$0xff]  ;;  %v134_v35 = vld [vmem:[%s781_s2 + $0x50] sm:$0xff]  ;;  %v133_v37 = vld [vmem:[%s781_s2 + $0x48] sm:$0xff]  ;;  %v160_v10 = vsub.s32 0, %v159_v9  ;;  %v164_v12 = vsub.s32 1, %v159_v9 }
  0x15   :  { %409 = vmatprep.subr.mxu0 %v484_v1  ;;  %183 = vmatpush1.msra.mxu1 %v140_v26  ;;  %v32_v36 = vld [vmem:[%s780_s1 + $0x10] sm:$0xff]  ;;  %v132_v38 = vld [vmem:[%s781_s2 + $0x40] sm:$0xff]  ;;  %v31_v39 = vld [vmem:[%s780_s1 + $0x8] sm:$0xff] }
  0x16   :  { %410 = vmatpush3.msra.mxu0 %v35_v27  ;;  %184 = vmatprep.subr.mxu1 %v139_v28  ;;  %v131_v40 = vld [vmem:[%s781_s2 + $0x38] sm:$0xff]  ;;  %v130_v41 = vld [vmem:[%s781_s2 + $0x30] sm:$0xff]  ;;  %v30_v42 = vld [vmem:[%s780_s1] sm:$0xff] }
  0x17   :  { %411 = vmatprep.subr.mxu0 %v484_v1  ;;  %185 = vmatpush1.msra.mxu1 %v138_v29  ;;  %v129_v43 = vld [vmem:[%s781_s2 + $0x28] sm:$0xff]  ;;  %v29_v44 = vld [vmem:[%s779_s0] sm:$0xff]  ;;  %v127_v46 = vld [vmem:[%s781_s2 + $0x18] sm:$0xff] }
  0x18   :  { %412 = vmatpush3.msra.mxu0 %v34_v30  ;;  %186 = vmatprep.subr.mxu1 %v137_v31  ;;  %v128_v45 = vld [vmem:[%s781_s2 + $0x20] sm:$0xff]  ;;  %v126_v47 = vld [vmem:[%s781_s2 + $0x10] sm:$0xff]  ;;  %v125_v48 = vld [vmem:[%s781_s2 + $0x8] sm:$0xff] }
  0x19   :  { %413 = vmatprep.subr.mxu0 %v484_v1  ;;  %187 = vmatpush1.msra.mxu1 %v136_v32  ;;  %v124_v49 = vld [vmem:[%s781_s2] sm:$0xff]  ;;  %v256_v50 = vld [vmem:[%s782_s3 + $0x78] sm:$0xff]  ;;  %v255_v51 = vld [vmem:[%s782_s3 + $0x70] sm:$0xff] }
  0x1a   :  { %414 = vmatpush3.msra.mxu0 %v33_v33  ;;  %188 = vmatprep.subr.mxu1 %v135_v34  ;;  %v254_v52 = vld [vmem:[%s782_s3 + $0x68] sm:$0xff]  ;;  %v253_v53 = vld [vmem:[%s782_s3 + $0x60] sm:$0xff]  ;;  %v252_v54 = vld [vmem:[%s782_s3 + $0x58] sm:$0xff] }
  0x1b   :  { %415 = vmatprep.subr.mxu0 %v484_v1  ;;  %189 = vmatpush1.msra.mxu1 %v134_v35  ;;  %v251_v55 = vld [vmem:[%s782_s3 + $0x50] sm:$0xff]  ;;  %v250_v56 = vld [vmem:[%s782_s3 + $0x48] sm:$0xff]  ;;  %v249_v57 = vld [vmem:[%s782_s3 + $0x40] sm:$0xff] }
  0x1c   :  { %416 = vmatpush3.msra.mxu0 %v32_v36  ;;  %190 = vmatprep.subr.mxu1 %v133_v37  ;;  %v248_v58 = vld [vmem:[%s782_s3 + $0x38] sm:$0xff]  ;;  %v247_v59 = vld [vmem:[%s782_s3 + $0x30] sm:$0xff]  ;;  %v246_v60 = vld [vmem:[%s782_s3 + $0x28] sm:$0xff] }
  0x1d   :  { %417 = vmatprep.subr.mxu0 %v484_v1  ;;  %191 = vmatpush1.msra.mxu1 %v132_v38  ;;  %v245_v61 = vld [vmem:[%s782_s3 + $0x20] sm:$0xff]  ;;  %v244_v4 = vld [vmem:[%s782_s3 + $0x18] sm:$0xff]  ;;  %v243_v5 = vld [vmem:[%s782_s3 + $0x10] sm:$0xff] }
  0x1e   :  { %418 = vmatpush3.msra.mxu0 %v31_v39  ;;  %192 = vmatprep.subr.mxu1 %v131_v40  ;;  %v353_v62 = vld [vmem:[%s783_s4] ss:$0 sm:$0xff]  ;;  %v242_v6 = vld [vmem:[%s782_s3 + $0x8] sm:$0xff] }
  0x1f   :  { %419 = vmatprep.subr.mxu0 %v484_v1  ;;  %193 = vmatpush1.msra.mxu1 %v130_v41  ;;  %v241_v7 = vld [vmem:[%s782_s3] sm:$0xff] }
  0x20   :  { %420 = vmatpush3.msra.mxu0 %v30_v42  ;;  %194 = vmatprep.subr.mxu1 %v129_v43  ;;  %v156_v11 = vld [vmem:[%s784_s5] sm:$0x3]  ;;  %s462_s5 = scalar_lea.vmem %s344_s26, 128 }
  0x21   :  { %422 = vmatmul.mubr.f32.vlgmr.msra.gmra.mxu0 %v29_v44  ;;  %424 = vmatprep.subr.mxu0 %v484_v1  ;;  %v161_v13 = vrot.slane %v156_v11, %v160_v10  ;;  %v165_v14 = vrot.slane %v156_v11, %v164_v12  ;;  %v354_v19 = vld [vmem:[%s785_s6] ss:$0 sm:$0xff]  ;;  %p463_p0 = scmp.ne.s32.totalorder %s344_s26, %s462_s5  ;;  %p468_p2 = scmp.lt.s32.totalorder %s462_s5, %s462_s5 }
  0x22   :  { %456 = vmatprep.mubr.msk.f32.mxu0 %vm485_vm0, %v484_v1  ;;  %195 = vmatpush1.msra.mxu1 %v128_v45 }
  0x23   :  { %196 = vmatprep.subr.mxu1 %v127_v46  ;;  %425 = vmatpush3.msra.mxu0 %v256_v50  ;;  %p469_p3 = por %p468_p2, %p467_p1 }
  0x24   :  { %197 = vmatpush1.msra.mxu1 %v126_v47  ;;  %426 = vmatprep.subr.mxu0 %v484_v1 }
  0x25   :  { %198 = vmatprep.subr.mxu1 %v125_v48  ;;  %427 = vmatpush3.msra.mxu0 %v255_v51  ;;  %p470_p4 = pnand %p469_p3, %p463_p0 }
  0x26   :  { %199 = vmatpush1.msra.mxu1 %v124_v49  ;;  %428 = vmatprep.subr.mxu0 %v484_v1 }
  0x27   :  { %429 = vmatpush3.msra.mxu0 %v254_v52 }
  0x28   :  { %430 = vmatprep.subr.mxu0 %v484_v1 }
  0x29   :  { %431 = vmatpush3.msra.mxu0 %v253_v53 }
  0x2a   :  { %432 = vmatprep.subr.mxu0 %v484_v1 }
  0x2b   :  { %433 = vmatpush3.msra.mxu0 %v252_v54 }
  0x2c   :  { %434 = vmatprep.subr.mxu0 %v484_v1 }
  0x2d   :  { %435 = vmatpush3.msra.mxu0 %v251_v55 }
  0x2e   :  { %436 = vmatprep.subr.mxu0 %v484_v1 }
  0x2f   :  { %437 = vmatpush3.msra.mxu0 %v250_v56 }
  0x30   :  { %438 = vmatprep.subr.mxu0 %v484_v1 }
  0x31   :  { %439 = vmatpush3.msra.mxu0 %v249_v57 }
  0x32   :  { %440 = vmatprep.subr.mxu0 %v484_v1 }
  0x33   :  { %441 = vmatpush3.msra.mxu0 %v248_v58 }
  0x34   :  { %442 = vmatprep.subr.mxu0 %v484_v1 }
  0x35   :  { %443 = vmatpush3.msra.mxu0 %v247_v59 }
  0x36   :  { %444 = vmatprep.subr.mxu0 %v484_v1 }
  0x37   :  { %445 = vmatpush3.msra.mxu0 %v246_v60 }
  0x38   :  { %446 = vmatprep.subr.mxu0 %v484_v1 }
  0x39   :  { %447 = vmatpush3.msra.mxu0 %v245_v61 }
  0x3a   :  { %448 = vmatprep.subr.mxu0 %v484_v1 }
  0x3b   :  { %449 = vmatpush3.msra.mxu0 %v244_v4 }
  0x3c   :  { %450 = vmatprep.subr.mxu0 %v484_v1 }
  0x3d   :  { %451 = vmatpush3.msra.mxu0 %v243_v5 }
  0x3e   :  { %452 = vmatprep.subr.mxu0 %v484_v1 }
  0x3f   :  { %453 = vmatpush3.msra.mxu0 %v242_v6 }
  0x40   :  { %454 = vmatprep.subr.mxu0 %v484_v1 }
  0x41   :  { %455 = vmatpush3.msra.mxu0 %v241_v7 }
  0xe1   :  { %v119_v63 = vpop.f32.mrf.mxu0 }
  0xe2   :  { %v120_v0 = vadd.f32 %v353_v62, %v119_v63 }
  0xe3   :  { %v423_v2 = vpop.f32.mrf.mxu0 }
  0xe4   :  { %v123_v3 = vmax.f32 %v120_v0, 0.0 }
  0xe6   :  { %233 = vmatmul.mubr.f32.vlgmr.msra.gmra.mxu1 %v123_v3 }
 0x1a6   :  { %v234_v15 = vpop.f32.mrf.mxu1 }
 0x1a7   :  { %v235_v16 = vadd.f32 %v234_v15, %v161_v13 }
 0x1a8   :  { %v236_v17 = vpop.f32.mrf.mxu1 }
 0x1a9   :  { %239 = vst [vmem:[%s786_s7] sm:$0xff] %v235_v16  ;;  %v237_v1 = vadd.f32 %v236_v17, %v165_v14 }
 0x1ab   :  { %v240_v18 = vmax.f32 %v237_v1, 0.0 }
 0x1ad   :  { %457 = vmatmul.mubr.f32.vlgmr.msra.gmra.mxu0 %v240_v18 }
 0x26d   :  { %v330_v20 = vpop.f32.mrf.mxu0 }
 0x26e   :  { %v331_v21 = vadd.f32 %v354_v19, %v330_v20 }
 0x26f   :  { %v458_v22 = vpop.f32.mrf.mxu0 }
 0x270   :  { %334 = vst [vmem:[#allocation2] sm:$0xff] %v331_v21 }
 0x271   :  { %473 = shalt.err (!%p470_p4)
}
 0x272   :  { %346 = dma.vmem_to_hbm [thread:$0]  %s344_s26, 128, %s787_s8, [#allocation3]  }
 0x273   :  { %482 = dma.done.wait [#allocation3], 128  }
 0x274   :  { %483 = vsyncadd [#allocation3], 4294967168 }
 0x275   :  { %352 = vsyncpa [#allocation3], 1 }

</bundles_post_ra>
